<compile_context>
chip_gen: v6e
topology: v6e:2x2x1
jax: 0.10.0
libtpu: 0.0.40
codegen_flags: <defaults>
</compile_context>

<pallas_src>
import functools

import jax
import jax.numpy as jnp
from jax import lax
from jax.experimental import pallas as pl
from jax.experimental.pallas import tpu as pltpu

INPUT_DIM = 4
HIDDEN_DIM = 512
OUTPUT_DIM = 1
NUM_LAYERS = 8


def _round_up(x, m):
    return (x + m - 1) // m * m


def mlp_kernel(x_ref, w0_ref, b0_ref, wh_ref, bh_ref, wo_ref, bo_ref, o_ref,
               *, num_layers):
    compute_dtype = x_ref.dtype

    # Initial layer: (TB, in) @ (in, H) + (1, H) -> tanh (f32 accumulation).
    h = jnp.tanh(
        jnp.dot(x_ref[...], w0_ref[...], preferred_element_type=jnp.float32)
        + b0_ref[...]
    ).astype(compute_dtype)

    # Hidden layers: rolled loop with dynamic first-axis indexing into the
    # resident (L, H, H) weight slab keeps live ranges bounded.
    def body(layer, h):
        acc = jnp.dot(h, wh_ref[layer], preferred_element_type=jnp.float32)
        return jnp.tanh(acc + bh_ref[layer]).astype(compute_dtype)

    h = lax.fori_loop(0, num_layers, body, h)

    # Output layer is a (H -> 1) projection: multiply + lane reduction on the
    # VPU/XLU instead of a 1-output-column MXU matmul.
    hf = h.astype(jnp.float32)
    wo = wo_ref[...].astype(jnp.float32)                       # (1, H)
    y = jnp.sum(hf * wo, axis=-1, keepdims=True) + bo_ref[...]  # (TB, 1)
    o_ref[...] = y.astype(o_ref.dtype)


def mlp_forward(x, params, *, tile_b=256, compute_dtype=None):
    """Fused MLP forward.  compute_dtype (e.g. jnp.bfloat16) sets the MXU
    input dtype; accumulation / bias / tanh stay in f32."""
    w0, b0, wh, bh, wo, bo = params
    if compute_dtype is None:
        compute_dtype = x.dtype

    orig_shape = x.shape
    in_dim = orig_shape[-1]
    assert in_dim == w0.shape[0]
    x2 = x.reshape(-1, in_dim)
    B = x2.shape[0]

    # Batch tiling: rows must be a multiple of 8; pad B up so the grid divides.
    tile_b = min(tile_b, _round_up(B, 8))
    B_pad = _round_up(B, tile_b)
    if B_pad != B:
        x2 = jnp.pad(x2, ((0, B_pad - B), (0, 0)))
    num_tiles = B_pad // tile_b

    # MXU inputs in compute_dtype (bf16 halves weight VMEM/DMA on v6e/v7x).
    x2 = x2.astype(compute_dtype)
    w0c = w0.astype(compute_dtype)
    whc = wh.astype(compute_dtype)
    wo_row = wo.reshape(1, HIDDEN_DIM).astype(compute_dtype)   # (1, H) row
    b0f = b0.astype(jnp.float32)
    bhf = bh.astype(jnp.float32)
    bof = bo.reshape(1, OUTPUT_DIM).astype(jnp.float32)

    full2 = lambda i: (0, 0)
    full3 = lambda i: (0, 0, 0)

    flops = 2 * B_pad * (in_dim * HIDDEN_DIM
                         + NUM_LAYERS * HIDDEN_DIM * HIDDEN_DIM
                         + HIDDEN_DIM * OUTPUT_DIM)
    transcendentals = B_pad * HIDDEN_DIM * (NUM_LAYERS + 1)
    bytes_accessed = int(
        x2.size * x2.dtype.itemsize
        + w0c.size * w0c.dtype.itemsize
        + whc.size * whc.dtype.itemsize
        + wo_row.size * wo_row.dtype.itemsize
        + (b0f.size + bhf.size + bof.size) * 4
        + B_pad * OUTPUT_DIM * 4)

    kernel = functools.partial(mlp_kernel, num_layers=NUM_LAYERS)
    out = pl.pallas_call(
        kernel,
        out_shape=jax.ShapeDtypeStruct((B_pad, OUTPUT_DIM), jnp.float32),
        grid_spec=pltpu.PrefetchScalarGridSpec(
            num_scalar_prefetch=0,
            grid=(num_tiles,),
            in_specs=[
                pl.BlockSpec((tile_b, in_dim), lambda i: (i, 0)),            # x tile
                pl.BlockSpec((in_dim, HIDDEN_DIM), full2),                   # w0
                pl.BlockSpec((1, HIDDEN_DIM), full2),                        # b0
                pl.BlockSpec((NUM_LAYERS, HIDDEN_DIM, HIDDEN_DIM), full3),   # wh
                pl.BlockSpec((NUM_LAYERS, 1, HIDDEN_DIM), full3),            # bh
                pl.BlockSpec((1, HIDDEN_DIM), full2),                        # wo row
                pl.BlockSpec((1, OUTPUT_DIM), full2),                        # bo
            ],
            out_specs=pl.BlockSpec((tile_b, OUTPUT_DIM), lambda i: (i, 0)),
        ),
        compiler_params=pltpu.CompilerParams(
            dimension_semantics=("parallel",),
            vmem_limit_bytes=48 << 20,   # fits f32/bf16 footprint, < v7x 64 MiB
        ),
        cost_estimate=pl.CostEstimate(
            flops=flops,
            transcendentals=transcendentals,
            bytes_accessed=bytes_accessed,
        ),
    )(x2, w0c, b0f, whc, bhf, wo_row, bof)

    out = out[:B].astype(x.dtype)
    return out.reshape(*orig_shape[:-1], OUTPUT_DIM)


def init_params(key):
    """Deterministic init mimicking PyTorch Linear default (U[-1/sqrt(fan_in), +])."""
    ks = jax.random.split(key, 6)

    def uni(k, shape, fan_in):
        bound = 1.0 / jnp.sqrt(fan_in)
        return jax.random.uniform(k, shape, jnp.float32, -bound, bound)

    w0 = uni(ks[0], (INPUT_DIM, HIDDEN_DIM), INPUT_DIM)
    b0 = uni(ks[1], (1, HIDDEN_DIM), INPUT_DIM)
    wh = uni(ks[2], (NUM_LAYERS, HIDDEN_DIM, HIDDEN_DIM), HIDDEN_DIM)
    bh = uni(ks[3], (NUM_LAYERS, 1, HIDDEN_DIM), HIDDEN_DIM)
    wo = uni(ks[4], (HIDDEN_DIM, OUTPUT_DIM), HIDDEN_DIM)
    bo = uni(ks[5], (1, OUTPUT_DIM), HIDDEN_DIM)
    return w0, b0, wh, bh, wo, bo


def mlp_reference(x, params):
    w0, b0, wh, bh, wo, bo = params
    h = jnp.tanh(x @ w0 + b0)
    for layer in range(NUM_LAYERS):
        h = jnp.tanh(h @ wh[layer] + bh[layer])
    return h @ wo + bo


if __name__ == "__main__":
    key = jax.random.PRNGKey(0)
    k_param, k_x = jax.random.split(key)

    B = 16  # small test batch (kernel pads/tiles internally)
    x = jax.random.normal(k_x, (B, INPUT_DIM), dtype=jnp.float32)
    params = init_params(k_param)

    ref = mlp_reference(x, params)

    # f32 path: strict check.
    out = jax.block_until_ready(mlp_forward(x, params))
    assert out.shape == (B, OUTPUT_DIM), out.shape
    assert jnp.allclose(out, ref, atol=1e-4, rtol=1e-4), (
        float(jnp.max(jnp.abs(out - ref)))
    )

    # bf16 MXU-input path (f32 accumulation): looser tolerance.
    out_bf16 = jax.block_until_ready(
        mlp_forward(x, params, compute_dtype=jnp.bfloat16))
    assert out_bf16.shape == (B, OUTPUT_DIM), out_bf16.shape
    assert jnp.allclose(out_bf16, ref, atol=2e-1, rtol=2e-1), (
        float(jnp.max(jnp.abs(out_bf16 - ref)))
    )

    print("KERNEL_OK")
</pallas_src>

<mosaic_0001>
module attributes {stable_mosaic.version = 11 : i64} {
  func.func @mlp_kernel(%arg0: i32, %arg1: memref<16x4xf32, #tpu.memory_space<vmem>>, %arg2: memref<4x512xf32, #tpu.memory_space<vmem>>, %arg3: memref<1x512xf32, #tpu.memory_space<vmem>>, %arg4: memref<8x512x512xf32, #tpu.memory_space<vmem>>, %arg5: memref<8x1x512xf32, #tpu.memory_space<vmem>>, %arg6: memref<1x512xf32, #tpu.memory_space<vmem>>, %arg7: memref<1x1xf32, #tpu.memory_space<vmem>>, %arg8: memref<16x1xf32, #tpu.memory_space<vmem>>) attributes {dimension_semantics = [#tpu.dimension_semantics<parallel>], iteration_bounds = array<i64: 1>, scalar_prefetch = 0 : i64, scratch_operands = 0 : i64, tpu.core_type = #tpu.core_type<tc>, window_params = [{transform_indices = @transform_0, window_bounds = array<i64: 16, 4>}, {pipeline_mode = #tpu.pipeline_mode<synchronous>, transform_indices = @transform_1, window_bounds = array<i64: 4, 512>}, {pipeline_mode = #tpu.pipeline_mode<synchronous>, transform_indices = @transform_2, window_bounds = array<i64: 1, 512>}, {pipeline_mode = #tpu.pipeline_mode<synchronous>, transform_indices = @transform_3, window_bounds = array<i64: 8, 512, 512>}, {pipeline_mode = #tpu.pipeline_mode<synchronous>, transform_indices = @transform_4, window_bounds = array<i64: 8, 1, 512>}, {pipeline_mode = #tpu.pipeline_mode<synchronous>, transform_indices = @transform_5, window_bounds = array<i64: 1, 512>}, {pipeline_mode = #tpu.pipeline_mode<synchronous>, transform_indices = @transform_6, window_bounds = array<i64: 1, 1>}, {transform_indices = @transform_7, window_bounds = array<i64: 16, 1>}]} {
    %c0 = arith.constant 0 : index
    %c0_0 = arith.constant 0 : index
    %0 = vector.load %arg1[%c0, %c0_0] : memref<16x4xf32, #tpu.memory_space<vmem>>, vector<16x4xf32>
    %c0_1 = arith.constant 0 : index
    %c0_2 = arith.constant 0 : index
    %1 = vector.load %arg2[%c0_1, %c0_2] : memref<4x512xf32, #tpu.memory_space<vmem>>, vector<4x512xf32>
    %cst = arith.constant dense<0.000000e+00> : vector<16x512xf32>
    %2 = tpu.matmul %0, %1, %cst {dimension_numbers = #tpu.dot_dimension_numbers<[1], [0], [0], [1], [0, 0, 1, 1], [], []>} : vector<16x4xf32>, vector<4x512xf32>, vector<16x512xf32> -> vector<16x512xf32>
    %c0_3 = arith.constant 0 : index
    %c0_4 = arith.constant 0 : index
    %3 = vector.load %arg3[%c0_3, %c0_4] : memref<1x512xf32, #tpu.memory_space<vmem>>, vector<1x512xf32>
    %4 = vector.broadcast %3 : vector<1x512xf32> to vector<16x512xf32>
    %5 = arith.addf %2, %4 : vector<16x512xf32>
    %6 = math.tanh %5 : vector<16x512xf32>
    %c0_i32 = arith.constant 0 : i32
    %c8_i32 = arith.constant 8 : i32
    %7 = arith.addi %c0_i32, %c8_i32 : i32
    %c1_i32 = arith.constant 1 : i32
    %8 = scf.for %arg9 = %c0_i32 to %7 step %c1_i32 iter_args(%arg10 = %6) -> (vector<16x512xf32>)  : i32 {
      %18 = arith.index_cast %arg9 : i32 to index
      %c0_13 = arith.constant 0 : index
      %c0_14 = arith.constant 0 : index
      %19 = vector.load %arg4[%18, %c0_13, %c0_14] : memref<8x512x512xf32, #tpu.memory_space<vmem>>, vector<1x512x512xf32>
      %20 = vector.shape_cast %19 : vector<1x512x512xf32> to vector<512x512xf32>
      %cst_15 = arith.constant dense<0.000000e+00> : vector<16x512xf32>
      %21 = tpu.matmul %arg10, %20, %cst_15 {dimension_numbers = #tpu.dot_dimension_numbers<[1], [0], [0], [1], [0, 0, 1, 1], [], []>} : vector<16x512xf32>, vector<512x512xf32>, vector<16x512xf32> -> vector<16x512xf32>
      %22 = arith.index_cast %arg9 : i32 to index
      %c0_16 = arith.constant 0 : index
      %c0_17 = arith.constant 0 : index
      %23 = vector.load %arg5[%22, %c0_16, %c0_17] : memref<8x1x512xf32, #tpu.memory_space<vmem>>, vector<1x1x512xf32>
      %24 = vector.shape_cast %23 : vector<1x1x512xf32> to vector<1x512xf32>
      %25 = vector.broadcast %24 : vector<1x512xf32> to vector<16x512xf32>
      %26 = arith.addf %21, %25 : vector<16x512xf32>
      %27 = math.tanh %26 : vector<16x512xf32>
      scf.yield %27 : vector<16x512xf32>
    }
    %c8_i32_5 = arith.constant 8 : i32
    %c0_6 = arith.constant 0 : index
    %c0_7 = arith.constant 0 : index
    %9 = vector.load %arg6[%c0_6, %c0_7] : memref<1x512xf32, #tpu.memory_space<vmem>>, vector<1x512xf32>
    %10 = vector.broadcast %9 : vector<1x512xf32> to vector<16x512xf32>
    %11 = arith.mulf %8, %10 : vector<16x512xf32>
    %cst_8 = arith.constant dense<0.000000e+00> : vector<16xf32>
    %12 = vector.multi_reduction <add>, %11, %cst_8 [1] : vector<16x512xf32> to vector<16xf32>
    %13 = vector.shape_cast %12 : vector<16xf32> to vector<16x1xf32>
    %c0_9 = arith.constant 0 : index
    %c0_10 = arith.constant 0 : index
    %14 = vector.load %arg7[%c0_9, %c0_10] : memref<1x1xf32, #tpu.memory_space<vmem>>, vector<1x1xf32>
    %15 = vector.broadcast %14 : vector<1x1xf32> to vector<16x1xf32>
    %16 = arith.addf %13, %15 : vector<16x1xf32>
    %c0_11 = arith.constant 0 : index
    %c0_12 = arith.constant 0 : index
    %17 = vector.load %arg8[%c0_11, %c0_12] : memref<16x1xf32, #tpu.memory_space<vmem>>, vector<16x1xf32>
    tpu.vector_store %arg8[%c0_11, %c0_12], %16 {strides = array<i32>} : memref<16x1xf32, #tpu.memory_space<vmem>>, vector<16x1xf32>,
    return
  }
  func.func @transform_0(%arg0: i32) -> (i32, i32) {
    %c0_i32 = arith.constant 0 : i32
    %c0_i32_0 = arith.constant 0 : i32
    return %arg0, %c0_i32 : i32, i32
  }
  func.func @transform_1(%arg0: i32) -> (i32, i32) {
    %c0_i32 = arith.constant 0 : i32
    %c0_i32_0 = arith.constant 0 : i32
    %c0_i32_1 = arith.constant 0 : i32
    return %c0_i32, %c0_i32_0 : i32, i32
  }
  func.func @transform_2(%arg0: i32) -> (i32, i32) {
    %c0_i32 = arith.constant 0 : i32
    %c0_i32_0 = arith.constant 0 : i32
    %c0_i32_1 = arith.constant 0 : i32
    return %c0_i32, %c0_i32_0 : i32, i32
  }
  func.func @transform_3(%arg0: i32) -> (i32, i32, i32) {
    %c0_i32 = arith.constant 0 : i32
    %c0_i32_0 = arith.constant 0 : i32
    %c0_i32_1 = arith.constant 0 : i32
    %c0_i32_2 = arith.constant 0 : i32
    return %c0_i32, %c0_i32_0, %c0_i32_1 : i32, i32, i32
  }
  func.func @transform_4(%arg0: i32) -> (i32, i32, i32) {
    %c0_i32 = arith.constant 0 : i32
    %c0_i32_0 = arith.constant 0 : i32
    %c0_i32_1 = arith.constant 0 : i32
    %c0_i32_2 = arith.constant 0 : i32
    return %c0_i32, %c0_i32_0, %c0_i32_1 : i32, i32, i32
  }
  func.func @transform_5(%arg0: i32) -> (i32, i32) {
    %c0_i32 = arith.constant 0 : i32
    %c0_i32_0 = arith.constant 0 : i32
    %c0_i32_1 = arith.constant 0 : i32
    return %c0_i32, %c0_i32_0 : i32, i32
  }
  func.func @transform_6(%arg0: i32) -> (i32, i32) {
    %c0_i32 = arith.constant 0 : i32
    %c0_i32_0 = arith.constant 0 : i32
    %c0_i32_1 = arith.constant 0 : i32
    return %c0_i32, %c0_i32_0 : i32, i32
  }
  func.func @transform_7(%arg0: i32) -> (i32, i32) {
    %c0_i32 = arith.constant 0 : i32
    %c0_i32_0 = arith.constant 0 : i32
    return %arg0, %c0_i32 : i32, i32
  }
}

</mosaic_0001>

<bundles_post_ra>
// kernel: tpu_custom_call.1
= control target key start
LH: loop header
LB: loop body
LE: loop exit
PB: predicated region body
PF: predicated region fallthrough
CT: control target
= control target key end

     0   :  { %s1750_s0 = inlined_call_operand.vmem [shape: f32[16,4], index: 0, kind: input, shape index: {}]   ;;  %s1751_s1 = inlined_call_operand.hbm [shape: f32[4,512], index: 1, kind: input, shape index: {}]   ;;  %s1752_s2 = inlined_call_operand.hbm [shape: f32[1,512], index: 2, kind: input, shape index: {}]   ;;  %s1753_s3 = inlined_call_operand.hbm [shape: f32[8,512,512], index: 3, kind: input, shape index: {}]   ;;  %s1754_s4 = inlined_call_operand.hbm [shape: f32[8,1,512], index: 4, kind: input, shape index: {}]   ;;  %s1755_s5 = inlined_call_operand.hbm [shape: f32[1,512], index: 5, kind: input, shape index: {}]   ;;  %s1756_s6 = inlined_call_operand.<no memory space> [shape: f32[1,1], index: 6, kind: input, shape index: {}]   ;;  %s1757_s7 = inlined_call_operand.vmem [shape: f32[16,1], index: 7, kind: output, shape index: {}]  }
   0x1   :  { %v12_v0 = vstv %s1756_s6 }
   0x2   :  { %13 = vst [vmem:[#allocation2] sm:$0x1] %v12_v0 }
   0x3   :  { %14 = vsyncpa [#allocation4], 0 }
   0x4   :  { %15 = vsyncpa [#allocation6], 0 }
   0x5   :  { %16 = vsyncpa [#allocation9], 0  ;;  %s1310_s26 = smov [#allocation5]   ;;  %s1311_s28 = smov [#allocation8]  }
   0x6   :  { %s35_s27 = sshll.u32 %s1310_s26, 4  ;;  %s56_s29 = sshll.u32 %s1311_s28, 4  ;;  %s36_s27 = int_to_ptr.vmem [resolvable:$true] %s35_s27  ;;  %s57_s29 = int_to_ptr.vmem [resolvable:$true] %s56_s29 }
   0x7   :  { %s1140_s30 = scalar_lea.vmem %s36_s27, 64  ;;  %p1145_p1 = scmp.lt.s32.totalorder %s36_s27, %s36_s27 }
   0x8   :  { %p1141_p0 = scmp.ne.s32.totalorder %s36_s27, %s1140_s30  ;;  %p1146_p2 = scmp.lt.s32.totalorder %s1140_s30, %s1140_s30 }
   0xa   :  { %p1147_p3 = por %p1146_p2, %p1145_p1 }
   0xc   :  { %p1148_p4 = pnand %p1147_p3, %p1141_p0 }
   0xe   :  { %1151 = shalt.err (!%p1148_p4)
}
   0xf   :  { %38 = dma.hbm_to_vmem [thread:$0]  %s1752_s2, 64, %s36_s27, [#allocation6]  }
  0x10   :  { %s1160_s6 = scalar_lea.vmem %s57_s29, 512  ;;  %p1165_p6 = scmp.lt.s32.totalorder %s57_s29, %s57_s29 }
  0x11   :  { %p1161_p5 = scmp.ne.s32.totalorder %s57_s29, %s1160_s6  ;;  %p1166_p7 = scmp.lt.s32.totalorder %s1160_s6, %s1160_s6 }
  0x13   :  { %p1167_p8 = por %p1166_p7, %p1165_p6 }
  0x15   :  { %p1168_p9 = pnand %p1167_p8, %p1161_p5 }
  0x17   :  { %1171 = shalt.err (!%p1168_p9)
}
  0x18   :  { %s1312_s10 = smov 64   ;;  %s1313_s11 = smov 4  }
  0x19   :  { %62 = dma.hbm_to_vmem [thread:$0]  %s1754_s4, 512, %s57_s29, [#allocation9], %s1312_s10, %s1312_s10, %s1313_s11  }
  0x1a   :  { %s1314_s14 = smov [#allocation3]   ;;  %s1315_s16 = smov [#allocation7]  }
  0x1b   :  { %s25_s15 = sshll.u32 %s1314_s14, 4  ;;  %s44_s17 = sshll.u32 %s1315_s16, 4  ;;  %s26_s15 = int_to_ptr.vmem [resolvable:$true] %s25_s15  ;;  %s45_s17 = int_to_ptr.vmem [resolvable:$true] %s44_s17 }
  0x1c   :  { %s1180_s2 = scalar_lea.vmem %s26_s15, 256  ;;  %p1185_p11 = scmp.lt.s32.totalorder %s26_s15, %s26_s15 }
  0x1d   :  { %p1181_p10 = scmp.ne.s32.totalorder %s26_s15, %s1180_s2  ;;  %p1186_p12 = scmp.lt.s32.totalorder %s1180_s2, %s1180_s2 }
  0x1f   :  { %p1187_p13 = por %p1186_p12, %p1185_p11 }
  0x21   :  { %p1188_p0 = pnand %p1187_p13, %p1181_p10 }
  0x23   :  { %1191 = shalt.err (!%p1188_p0)
}
  0x24   :  { %28 = dma.hbm_to_vmem [thread:$0]  %s1751_s1, 256, %s26_s15, [#allocation4]  }
  0x25   :  { %s1200_s20 = scalar_lea.vmem %s45_s17, 262144  ;;  %p1205_p2 = scmp.lt.s32.totalorder %s45_s17, %s45_s17 }
  0x26   :  { %p1201_p1 = scmp.ne.s32.totalorder %s45_s17, %s1200_s20  ;;  %p1206_p3 = scmp.lt.s32.totalorder %s1200_s20, %s1200_s20 }
  0x28   :  { %p1207_p4 = por %p1206_p3, %p1205_p2 }
  0x2a   :  { %p1208_p5 = pnand %p1207_p4, %p1201_p1 }
  0x2c   :  { %1211 = shalt.err (!%p1208_p5)
}
  0x2d   :  { %s1316_s4 = smov 512   ;;  %s1317_s21 = smov 32  }
  0x2e   :  { %50 = dma.hbm_to_vmem [thread:$0]  %s1753_s3, 262144, %s45_s17, [#allocation6], %s1316_s4, %s1316_s4, %s1317_s21  }
  0x2f   :  { %s1318_s24 = smov [#allocation10]  }
  0x30   :  { %s69_s25 = sshll.u32 %s1318_s24, 4  ;;  %s70_s25 = int_to_ptr.vmem [resolvable:$true] %s69_s25 }
  0x31   :  { %s1220_s26 = scalar_lea.vmem %s70_s25, 64  ;;  %p1225_p7 = scmp.lt.s32.totalorder %s70_s25, %s70_s25 }
  0x32   :  { %p1221_p6 = scmp.ne.s32.totalorder %s70_s25, %s1220_s26  ;;  %p1226_p8 = scmp.lt.s32.totalorder %s1220_s26, %s1220_s26 }
  0x34   :  { %p1227_p9 = por %p1226_p8, %p1225_p7 }
  0x36   :  { %p1228_p10 = pnand %p1227_p9, %p1221_p6 }
  0x38   :  { %1231 = shalt.err (!%p1228_p10)
}
  0x39   :  { %72 = dma.hbm_to_vmem [thread:$0]  %s1755_s5, 64, %s70_s25, [#allocation9]  }
  0x3a   :  { %1268 = dma.done.wait [#allocation4], 256  }
  0x3b   :  { %1269 = vsyncadd [#allocation4], 4294967040 }
  0x3c   :  { %1270 = dma.done.wait [#allocation6], 262208  }
  0x3d   :  { %1271 = vsyncadd [#allocation6], 4294705088 }
  0x3e   :  { %1272 = dma.done.wait [#allocation9], 576  }
  0x3f   :  { %1273 = vsyncadd [#allocation9], 4294966720  ;;  %v1319_v1 = vmov 0.0   ;;  %v92_v2 = vld [vmem:[#allocation3] sm:$0xff]  ;;  %vm127_vm0 = vcmask 1043456   ;;  %v93_v3 = vld [vmem:[#allocation3 + $0x8] sm:$0xff]  ;;  %v96_v8 = vlaneseq }
  0x40   :  { %200 = vmatprep.mubr.f32.mxu0 %v1319_v1  ;;  %277 = vmatprep.mubr.f32.mxu1 %v1319_v1  ;;  %v118_v4 = vcombine.high %v92_v2, %v92_v2  ;;  %v119_v5 = vcombine.high %v93_v3, %v93_v3  ;;  %v90_v6 = vld [vmem:[%s1750_s0] sm:$0xff]  ;;  %vm120_vm1 = vcmask 31744   ;;  %v91_v7 = vld [vmem:[%s1750_s0 + $0x8] sm:$0xff]  ;;  %v94_v12 = vld [vmem:[#allocation5] sm:$0xf]  ;;  %s1412_s0 = smov 0  }
  0x41   :  { %v97_v9 = vshrl.u32 %v96_v8, 7 }
  0x42   :  { %1003 = vmatprep.subr.msk.mxu0 %vm127_vm0, %v118_v4  ;;  %1007 = vmatprep.subr.msk.mxu1 %vm127_vm0, %v119_v5 }
  0x43   :  { %1004 = vmatpush1.msk.msra.mxu0 %vm127_vm0, %v92_v2  ;;  %1008 = vmatpush1.msk.msra.mxu1 %vm127_vm0, %v93_v3  ;;  %v1384_v10 = vsub.s32 0, %v97_v9  ;;  %v1386_v11 = vsub.s32 2, %v97_v9  ;;  %v1388_v13 = vsub.s32 1, %v97_v9  ;;  %v1390_v14 = vsub.s32 3, %v97_v9 }
  0x44   :  { %1005 = vmatmul.mubr.msk.f32.vlgmr.msra.gmra.mxu0 %vm120_vm1, %v90_v6  ;;  %1009 = vmatmul.mubr.msk.f32.vlgmr.msra.gmra.mxu1 %vm120_vm1, %v90_v6 }
  0x45   :  { %206 = vmatprep.mubr.f32.mxu0 %v1319_v1  ;;  %283 = vmatprep.mubr.f32.mxu1 %v1319_v1  ;;  %v99_v15 = vrot.slane %v94_v12, %v1384_v10  ;;  %v107_v16 = vrot.slane %v94_v12, %v1386_v11  ;;  %v103_v17 = vrot.slane %v94_v12, %v1388_v13 }
  0x46   :  { %v111_v18 = vrot.slane %v94_v12, %v1390_v14 }
  0x48   :  { %1006 = vmatmul.mubr.msk.f32.gmra.mxu0 %vm120_vm1, %v91_v7  ;;  %1010 = vmatmul.mubr.msk.f32.gmra.mxu1 %vm120_vm1, %v91_v7 }
 0x104   :  { %v202_v19 = vpop.f32.mrf.mxu0  ;;  %v279_v20 = vpop.f32.mrf.mxu1 }
 0x105   :  { %v203_v21 = vadd.f32 %v202_v19, %v99_v15  ;;  %v280_v22 = vadd.f32 %v279_v20, %v107_v16 }
 0x106   :  { %v204_v23 = vpop.f32.mrf.mxu0  ;;  %v281_v24 = vpop.f32.mrf.mxu1 }
 0x107   :  { %1100 = vtanh.f32 %v203_v21  ;;  %v205_v25 = vadd.f32 %v204_v23, %v103_v17  ;;  %v282_v26 = vadd.f32 %v281_v24, %v111_v18 }
 0x108   :  { %1102 = vtanh.f32 %v280_v22  ;;  %v208_v27 = vpop.f32.mrf.mxu0  ;;  %v285_v28 = vpop.f32.mrf.mxu1 }
 0x109   :  { %1104 = vtanh.f32 %v205_v25  ;;  %v209_v29 = vadd.f32 %v208_v27, %v99_v15  ;;  %v286_v30 = vadd.f32 %v285_v28, %v107_v16 }
 0x10a   :  { %1106 = vtanh.f32 %v282_v26  ;;  %v210_v31 = vpop.f32.mrf.mxu0  ;;  %v287_v32 = vpop.f32.mrf.mxu1 }
 0x10b   :  { %1108 = vtanh.f32 %v209_v29  ;;  %v211_v33 = vadd.f32 %v210_v31, %v103_v17  ;;  %v288_v34 = vadd.f32 %v287_v32, %v111_v18 }
 0x10c   :  { %1110 = vtanh.f32 %v286_v30 }
 0x10d   :  { %1112 = vtanh.f32 %v211_v33 }
 0x10e   :  { %1114 = vtanh.f32 %v288_v34 }
 0x114   :  { %v1101_v35 = vpop.eup %1100  }
 0x115   :  { %v1103_v36 = vpop.eup %1102  }
 0x116   :  { %v1105_v37 = vpop.eup %1104  }
 0x117   :  { %v1107_v38 = vpop.eup %1106  }
 0x118   :  { %v1109_v39 = vpop.eup %1108  }
 0x119   :  { %v1111_v40 = vpop.eup %1110  }
 0x11a   :  { %v1113_v41 = vpop.eup %1112  }
 0x11b   :  { %v1115_v42 = vpop.eup %1114  }
 0x11c LB: > { %s1015_s30 = sshll.u32 %s1308_s0, 11  ;;  %659 = vmatprep.mubr.f32.mxu0 %v1300_v37  ;;  %736 = vmatprep.mubr.f32.mxu1 %v1292_v38  ;;  %s1013_s9 = sshll.u32 %s1308_s0, 2  ;;  %s1308_s0 = sphi %s1412_s0, %s303_s0   ;;  %v1304_v35 = vphi %v1101_v35, %v1765_v35   ;;  %v1300_v37 = vphi %v1105_v37, %v1764_v37   ;;  %v1296_v36 = vphi %v1103_v36, %v1763_v36   ;;  %v1292_v38 = vphi %v1107_v38, %v1762_v38   ;;  %v1288_v39 = vphi %v1109_v39, %v1761_v39   ;;  %v1284_v41 = vphi %v1113_v41, %v1760_v41   ;;  %v1280_v40 = vphi %v1111_v40, %v1759_v40   ;;  %v1276_v42 = vphi %v1115_v42, %v1758_v42  }
 0x11d   : > { %s1444_s8 = scalar_lea.vmem [#allocation7], %s1015_s30  ;;  %s572_s6 = scalar_lea.vmem [#allocation8], %s1013_s9 }
 0x11e   : > { %v376_v43 = vld [vmem:[%s1444_s8 + $0x1e8] sm:$0xff]  ;;  %v375_v45 = vld [vmem:[%s1444_s8 + $0x1e0] sm:$0xff]  ;;  %s303_s0 = sadd.s32 1, %s1308_s0  }
 0x11f   : > { %v504_v44 = vld [vmem:[%s1444_s8 + $0x5e8] sm:$0xff]  ;;  %595 = vmatprep.subr.mxu0 %v376_v43  ;;  %v503_v46 = vld [vmem:[%s1444_s8 + $0x5e0] sm:$0xff]  ;;  %p300_p11 = scmp.ge.s32.totalorder %s303_s0, 8  }
 0x120   : > { %672 = vmatprep.subr.mxu1 %v504_v44  ;;  %v372_v47 = vld [vmem:[%s1444_s8 + $0x1c8] sm:$0xff]  ;;  %596 = vmatpush1.msra.mxu0 %v375_v45  ;;  %v371_v49 = vld [vmem:[%s1444_s8 + $0x1c0] sm:$0xff]  ;;  %vm960_vm2 = vcmask (%p300_p11), 7168  }
 0x121   : > { %v500_v48 = vld [vmem:[%s1444_s8 + $0x5c8] sm:$0xff]  ;;  %673 = vmatpush1.msra.mxu1 %v503_v46  ;;  %v499_v50 = vld [vmem:[%s1444_s8 + $0x5c0] sm:$0xff]  ;;  %597 = vmatprep.subr.mxu0 %v372_v47 }
 0x122   : > { %v368_v51 = vld [vmem:[%s1444_s8 + $0x1a8] sm:$0xff]  ;;  %674 = vmatprep.subr.mxu1 %v500_v48  ;;  %v367_v53 = vld [vmem:[%s1444_s8 + $0x1a0] sm:$0xff]  ;;  %598 = vmatpush1.msra.mxu0 %v371_v49 }
 0x123   : > { %v496_v52 = vld [vmem:[%s1444_s8 + $0x5a8] sm:$0xff]  ;;  %v495_v54 = vld [vmem:[%s1444_s8 + $0x5a0] sm:$0xff]  ;;  %675 = vmatpush1.msra.mxu1 %v499_v50  ;;  %599 = vmatprep.subr.mxu0 %v368_v51 }
 0x124   : > { %v364_v55 = vld [vmem:[%s1444_s8 + $0x188] sm:$0xff]  ;;  %676 = vmatprep.subr.mxu1 %v496_v52  ;;  %v363_v57 = vld [vmem:[%s1444_s8 + $0x180] sm:$0xff]  ;;  %600 = vmatpush1.msra.mxu0 %v367_v53 }
 0x125   : > { %v492_v56 = vld [vmem:[%s1444_s8 + $0x588] sm:$0xff]  ;;  %v491_v58 = vld [vmem:[%s1444_s8 + $0x580] sm:$0xff]  ;;  %677 = vmatpush1.msra.mxu1 %v495_v54  ;;  %601 = vmatprep.subr.mxu0 %v364_v55 }
 0x126   : > { %v360_v59 = vld [vmem:[%s1444_s8 + $0x168] sm:$0xff]  ;;  %678 = vmatprep.subr.mxu1 %v492_v56  ;;  %v359_v61 = vld [vmem:[%s1444_s8 + $0x160] sm:$0xff]  ;;  %602 = vmatpush1.msra.mxu0 %v363_v57 }
 0x127   : > { %v488_v60 = vld [vmem:[%s1444_s8 + $0x568] sm:$0xff]  ;;  %v487_v62 = vld [vmem:[%s1444_s8 + $0x560] sm:$0xff]  ;;  %679 = vmatpush1.msra.mxu1 %v491_v58  ;;  %603 = vmatprep.subr.mxu0 %v360_v59 }
 0x128   : > { %v356_v63 = vld [vmem:[%s1444_s8 + $0x148] sm:$0xff]  ;;  %680 = vmatprep.subr.mxu1 %v488_v60  ;;  %v355_v1 = vld [vmem:[%s1444_s8 + $0x140] sm:$0xff]  ;;  %604 = vmatpush1.msra.mxu0 %v359_v61 }
 0x129   : > { %v484_v0 = vld [vmem:[%s1444_s8 + $0x548] sm:$0xff]  ;;  %v483_v2 = vld [vmem:[%s1444_s8 + $0x540] sm:$0xff]  ;;  %681 = vmatpush1.msra.mxu1 %v487_v62  ;;  %605 = vmatprep.subr.mxu0 %v356_v63 }
 0x12a   : > { %v352_v3 = vld [vmem:[%s1444_s8 + $0x128] sm:$0xff]  ;;  %682 = vmatprep.subr.mxu1 %v484_v0  ;;  %v351_v5 = vld [vmem:[%s1444_s8 + $0x120] sm:$0xff]  ;;  %606 = vmatpush1.msra.mxu0 %v355_v1 }
 0x12b   : > { %v480_v4 = vld [vmem:[%s1444_s8 + $0x528] sm:$0xff]  ;;  %v479_v6 = vld [vmem:[%s1444_s8 + $0x520] sm:$0xff]  ;;  %683 = vmatpush1.msra.mxu1 %v483_v2  ;;  %607 = vmatprep.subr.mxu0 %v352_v3 }
 0x12c   : > { %v348_v7 = vld [vmem:[%s1444_s8 + $0x108] sm:$0xff]  ;;  %684 = vmatprep.subr.mxu1 %v480_v4  ;;  %v347_v9 = vld [vmem:[%s1444_s8 + $0x100] sm:$0xff]  ;;  %608 = vmatpush1.msra.mxu0 %v351_v5 }
 0x12d   : > { %v476_v8 = vld [vmem:[%s1444_s8 + $0x508] sm:$0xff]  ;;  %v475_v12 = vld [vmem:[%s1444_s8 + $0x500] sm:$0xff]  ;;  %685 = vmatpush1.msra.mxu1 %v479_v6  ;;  %609 = vmatprep.subr.mxu0 %v348_v7 }
 0x12e   : > { %v344_v15 = vld [vmem:[%s1444_s8 + $0xe8] sm:$0xff]  ;;  %686 = vmatprep.subr.mxu1 %v476_v8  ;;  %v343_v17 = vld [vmem:[%s1444_s8 + $0xe0] sm:$0xff]  ;;  %610 = vmatpush1.msra.mxu0 %v347_v9 }
 0x12f   : > { %v472_v16 = vld [vmem:[%s1444_s8 + $0x4e8] sm:$0xff]  ;;  %v471_v18 = vld [vmem:[%s1444_s8 + $0x4e0] sm:$0xff]  ;;  %687 = vmatpush1.msra.mxu1 %v475_v12  ;;  %611 = vmatprep.subr.mxu0 %v344_v15 }
 0x130   : > { %v340_v19 = vld [vmem:[%s1444_s8 + $0xc8] sm:$0xff]  ;;  %688 = vmatprep.subr.mxu1 %v472_v16  ;;  %v339_v21 = vld [vmem:[%s1444_s8 + $0xc0] sm:$0xff]  ;;  %612 = vmatpush1.msra.mxu0 %v343_v17 }
 0x131   : > { %v468_v20 = vld [vmem:[%s1444_s8 + $0x4c8] sm:$0xff]  ;;  %v467_v22 = vld [vmem:[%s1444_s8 + $0x4c0] sm:$0xff]  ;;  %689 = vmatpush1.msra.mxu1 %v471_v18  ;;  %613 = vmatprep.subr.mxu0 %v340_v19 }
 0x132   : > { %v336_v23 = vld [vmem:[%s1444_s8 + $0xa8] sm:$0xff]  ;;  %690 = vmatprep.subr.mxu1 %v468_v20  ;;  %v335_v25 = vld [vmem:[%s1444_s8 + $0xa0] sm:$0xff]  ;;  %614 = vmatpush1.msra.mxu0 %v339_v21 }
 0x133   : > { %v464_v24 = vld [vmem:[%s1444_s8 + $0x4a8] sm:$0xff]  ;;  %v463_v26 = vld [vmem:[%s1444_s8 + $0x4a0] sm:$0xff]  ;;  %691 = vmatpush1.msra.mxu1 %v467_v22  ;;  %615 = vmatprep.subr.mxu0 %v336_v23 }
 0x134   : > { %v332_v27 = vld [vmem:[%s1444_s8 + $0x88] sm:$0xff]  ;;  %692 = vmatprep.subr.mxu1 %v464_v24  ;;  %v331_v29 = vld [vmem:[%s1444_s8 + $0x80] sm:$0xff]  ;;  %616 = vmatpush1.msra.mxu0 %v335_v25 }
 0x135   : > { %v460_v28 = vld [vmem:[%s1444_s8 + $0x488] sm:$0xff]  ;;  %v459_v30 = vld [vmem:[%s1444_s8 + $0x480] sm:$0xff]  ;;  %693 = vmatpush1.msra.mxu1 %v463_v26  ;;  %617 = vmatprep.subr.mxu0 %v332_v27 }
 0x136   : > { %v328_v31 = vld [vmem:[%s1444_s8 + $0x68] sm:$0xff]  ;;  %694 = vmatprep.subr.mxu1 %v460_v28  ;;  %v327_v33 = vld [vmem:[%s1444_s8 + $0x60] sm:$0xff]  ;;  %618 = vmatpush1.msra.mxu0 %v331_v29 }
 0x137   : > { %v456_v32 = vld [vmem:[%s1444_s8 + $0x468] sm:$0xff]  ;;  %v455_v34 = vld [vmem:[%s1444_s8 + $0x460] sm:$0xff]  ;;  %695 = vmatpush1.msra.mxu1 %v459_v30  ;;  %619 = vmatprep.subr.mxu0 %v328_v31 }
 0x138   : > { %v324_v43 = vld [vmem:[%s1444_s8 + $0x48] sm:$0xff]  ;;  %696 = vmatprep.subr.mxu1 %v456_v32  ;;  %v323_v45 = vld [vmem:[%s1444_s8 + $0x40] sm:$0xff]  ;;  %620 = vmatpush1.msra.mxu0 %v327_v33 }
 0x139   : > { %v452_v44 = vld [vmem:[%s1444_s8 + $0x448] sm:$0xff]  ;;  %v451_v46 = vld [vmem:[%s1444_s8 + $0x440] sm:$0xff]  ;;  %697 = vmatpush1.msra.mxu1 %v455_v34  ;;  %621 = vmatprep.subr.mxu0 %v324_v43 }
 0x13a   : > { %v320_v47 = vld [vmem:[%s1444_s8 + $0x28] sm:$0xff]  ;;  %698 = vmatprep.subr.mxu1 %v452_v44  ;;  %v319_v49 = vld [vmem:[%s1444_s8 + $0x20] sm:$0xff]  ;;  %622 = vmatpush1.msra.mxu0 %v323_v45 }
 0x13b   : > { %v448_v48 = vld [vmem:[%s1444_s8 + $0x428] sm:$0xff]  ;;  %v447_v50 = vld [vmem:[%s1444_s8 + $0x420] sm:$0xff]  ;;  %699 = vmatpush1.msra.mxu1 %v451_v46  ;;  %623 = vmatprep.subr.mxu0 %v320_v47 }
 0x13c   : > { %v316_v51 = vld [vmem:[%s1444_s8 + $0x8] sm:$0xff]  ;;  %700 = vmatprep.subr.mxu1 %v448_v48  ;;  %v315_v53 = vld [vmem:[%s1444_s8] sm:$0xff]  ;;  %624 = vmatpush1.msra.mxu0 %v319_v49 }
 0x13d   : > { %v444_v52 = vld [vmem:[%s1444_s8 + $0x408] sm:$0xff]  ;;  %v443_v54 = vld [vmem:[%s1444_s8 + $0x400] sm:$0xff]  ;;  %701 = vmatpush1.msra.mxu1 %v447_v50  ;;  %625 = vmatprep.subr.mxu0 %v316_v51 }
 0x13e   : > { %v440_v55 = vld [vmem:[%s1444_s8 + $0x3e8] sm:$0xff]  ;;  %702 = vmatprep.subr.mxu1 %v444_v52  ;;  %v439_v57 = vld [vmem:[%s1444_s8 + $0x3e0] sm:$0xff]  ;;  %626 = vmatpush1.msra.mxu0 %v315_v53 }
 0x13f   : > { %v568_v56 = vld [vmem:[%s1444_s8 + $0x7e8] sm:$0xff]  ;;  %v567_v58 = vld [vmem:[%s1444_s8 + $0x7e0] sm:$0xff]  ;;  %703 = vmatpush1.msra.mxu1 %v443_v54  ;;  %627 = vmatprep.subr.mxu0 %v440_v55 }
 0x140   : > { %v436_v59 = vld [vmem:[%s1444_s8 + $0x3c8] sm:$0xff]  ;;  %704 = vmatprep.subr.mxu1 %v568_v56  ;;  %v435_v61 = vld [vmem:[%s1444_s8 + $0x3c0] sm:$0xff]  ;;  %628 = vmatpush2.msra.mxu0 %v439_v57 }
 0x141   : > { %v564_v60 = vld [vmem:[%s1444_s8 + $0x7c8] sm:$0xff]  ;;  %v563_v62 = vld [vmem:[%s1444_s8 + $0x7c0] sm:$0xff]  ;;  %705 = vmatpush2.msra.mxu1 %v567_v58  ;;  %629 = vmatprep.subr.mxu0 %v436_v59 }
 0x142   : > { %v432_v63 = vld [vmem:[%s1444_s8 + $0x3a8] sm:$0xff]  ;;  %706 = vmatprep.subr.mxu1 %v564_v60  ;;  %v431_v1 = vld [vmem:[%s1444_s8 + $0x3a0] sm:$0xff]  ;;  %630 = vmatpush2.msra.mxu0 %v435_v61 }
 0x143   : > { %v560_v0 = vld [vmem:[%s1444_s8 + $0x7a8] sm:$0xff]  ;;  %v559_v2 = vld [vmem:[%s1444_s8 + $0x7a0] sm:$0xff]  ;;  %707 = vmatpush2.msra.mxu1 %v563_v62  ;;  %631 = vmatprep.subr.mxu0 %v432_v63 }
 0x144   : > { %v428_v3 = vld [vmem:[%s1444_s8 + $0x388] sm:$0xff]  ;;  %708 = vmatprep.subr.mxu1 %v560_v0  ;;  %v427_v5 = vld [vmem:[%s1444_s8 + $0x380] sm:$0xff]  ;;  %632 = vmatpush2.msra.mxu0 %v431_v1 }
 0x145   : > { %v556_v4 = vld [vmem:[%s1444_s8 + $0x788] sm:$0xff]  ;;  %v555_v6 = vld [vmem:[%s1444_s8 + $0x780] sm:$0xff]  ;;  %709 = vmatpush2.msra.mxu1 %v559_v2  ;;  %633 = vmatprep.subr.mxu0 %v428_v3  ;;  %v378_v3 = vld [vmem:[%s1444_s8 + $0x1f8] sm:$0xff] }
 0x146   : > { %v424_v7 = vld [vmem:[%s1444_s8 + $0x368] sm:$0xff]  ;;  %710 = vmatprep.subr.mxu1 %v556_v4  ;;  %v423_v9 = vld [vmem:[%s1444_s8 + $0x360] sm:$0xff]  ;;  %634 = vmatpush2.msra.mxu0 %v427_v5  ;;  %v506_v4 = vld [vmem:[%s1444_s8 + $0x5f8] sm:$0xff] }
 0x147   : > { %v552_v8 = vld [vmem:[%s1444_s8 + $0x768] sm:$0xff]  ;;  %v551_v12 = vld [vmem:[%s1444_s8 + $0x760] sm:$0xff]  ;;  %711 = vmatpush2.msra.mxu1 %v555_v6  ;;  %635 = vmatprep.subr.mxu0 %v424_v7  ;;  %v377_v5 = vld [vmem:[%s1444_s8 + $0x1f0] sm:$0xff] }
 0x148   : > { %v420_v15 = vld [vmem:[%s1444_s8 + $0x348] sm:$0xff]  ;;  %712 = vmatprep.subr.mxu1 %v552_v8  ;;  %v419_v17 = vld [vmem:[%s1444_s8 + $0x340] sm:$0xff]  ;;  %636 = vmatpush2.msra.mxu0 %v423_v9  ;;  %v505_v6 = vld [vmem:[%s1444_s8 + $0x5f0] sm:$0xff] }
 0x149   : > { %v548_v16 = vld [vmem:[%s1444_s8 + $0x748] sm:$0xff]  ;;  %v547_v18 = vld [vmem:[%s1444_s8 + $0x740] sm:$0xff]  ;;  %713 = vmatpush2.msra.mxu1 %v551_v12  ;;  %637 = vmatprep.subr.mxu0 %v420_v15  ;;  %v374_v7 = vld [vmem:[%s1444_s8 + $0x1d8] sm:$0xff] }
 0x14a   : > { %v416_v19 = vld [vmem:[%s1444_s8 + $0x328] sm:$0xff]  ;;  %714 = vmatprep.subr.mxu1 %v548_v16  ;;  %v415_v21 = vld [vmem:[%s1444_s8 + $0x320] sm:$0xff]  ;;  %638 = vmatpush2.msra.mxu0 %v419_v17  ;;  %v502_v8 = vld [vmem:[%s1444_s8 + $0x5d8] sm:$0xff] }
 0x14b   : > { %v544_v20 = vld [vmem:[%s1444_s8 + $0x728] sm:$0xff]  ;;  %v543_v22 = vld [vmem:[%s1444_s8 + $0x720] sm:$0xff]  ;;  %715 = vmatpush2.msra.mxu1 %v547_v18  ;;  %639 = vmatprep.subr.mxu0 %v416_v19  ;;  %v373_v9 = vld [vmem:[%s1444_s8 + $0x1d0] sm:$0xff] }
 0x14c   : > { %v412_v23 = vld [vmem:[%s1444_s8 + $0x308] sm:$0xff]  ;;  %716 = vmatprep.subr.mxu1 %v544_v20  ;;  %v411_v25 = vld [vmem:[%s1444_s8 + $0x300] sm:$0xff]  ;;  %640 = vmatpush2.msra.mxu0 %v415_v21  ;;  %v501_v12 = vld [vmem:[%s1444_s8 + $0x5d0] sm:$0xff] }
 0x14d   : > { %v540_v24 = vld [vmem:[%s1444_s8 + $0x708] sm:$0xff]  ;;  %v539_v26 = vld [vmem:[%s1444_s8 + $0x700] sm:$0xff]  ;;  %717 = vmatpush2.msra.mxu1 %v543_v22  ;;  %641 = vmatprep.subr.mxu0 %v412_v23  ;;  %v370_v15 = vld [vmem:[%s1444_s8 + $0x1b8] sm:$0xff] }
 0x14e   : > { %v408_v27 = vld [vmem:[%s1444_s8 + $0x2e8] sm:$0xff]  ;;  %718 = vmatprep.subr.mxu1 %v540_v24  ;;  %v407_v29 = vld [vmem:[%s1444_s8 + $0x2e0] sm:$0xff]  ;;  %642 = vmatpush2.msra.mxu0 %v411_v25  ;;  %v498_v16 = vld [vmem:[%s1444_s8 + $0x5b8] sm:$0xff] }
 0x14f   : > { %v536_v28 = vld [vmem:[%s1444_s8 + $0x6e8] sm:$0xff]  ;;  %v535_v30 = vld [vmem:[%s1444_s8 + $0x6e0] sm:$0xff]  ;;  %719 = vmatpush2.msra.mxu1 %v539_v26  ;;  %643 = vmatprep.subr.mxu0 %v408_v27  ;;  %v369_v17 = vld [vmem:[%s1444_s8 + $0x1b0] sm:$0xff] }
 0x150   : > { %v404_v31 = vld [vmem:[%s1444_s8 + $0x2c8] sm:$0xff]  ;;  %720 = vmatprep.subr.mxu1 %v536_v28  ;;  %v403_v33 = vld [vmem:[%s1444_s8 + $0x2c0] sm:$0xff]  ;;  %644 = vmatpush2.msra.mxu0 %v407_v29  ;;  %v497_v18 = vld [vmem:[%s1444_s8 + $0x5b0] sm:$0xff] }
 0x151   : > { %v532_v32 = vld [vmem:[%s1444_s8 + $0x6c8] sm:$0xff]  ;;  %v531_v34 = vld [vmem:[%s1444_s8 + $0x6c0] sm:$0xff]  ;;  %721 = vmatpush2.msra.mxu1 %v535_v30  ;;  %645 = vmatprep.subr.mxu0 %v404_v31  ;;  %v366_v19 = vld [vmem:[%s1444_s8 + $0x198] sm:$0xff] }
 0x152   : > { %v400_v43 = vld [vmem:[%s1444_s8 + $0x2a8] sm:$0xff]  ;;  %722 = vmatprep.subr.mxu1 %v532_v32  ;;  %v399_v45 = vld [vmem:[%s1444_s8 + $0x2a0] sm:$0xff]  ;;  %646 = vmatpush2.msra.mxu0 %v403_v33  ;;  %v494_v20 = vld [vmem:[%s1444_s8 + $0x598] sm:$0xff] }
 0x153   : > { %v528_v44 = vld [vmem:[%s1444_s8 + $0x6a8] sm:$0xff]  ;;  %v527_v46 = vld [vmem:[%s1444_s8 + $0x6a0] sm:$0xff]  ;;  %723 = vmatpush2.msra.mxu1 %v531_v34  ;;  %647 = vmatprep.subr.mxu0 %v400_v43  ;;  %v365_v21 = vld [vmem:[%s1444_s8 + $0x190] sm:$0xff] }
 0x154   : > { %v396_v47 = vld [vmem:[%s1444_s8 + $0x288] sm:$0xff]  ;;  %724 = vmatprep.subr.mxu1 %v528_v44  ;;  %v395_v49 = vld [vmem:[%s1444_s8 + $0x280] sm:$0xff]  ;;  %648 = vmatpush2.msra.mxu0 %v399_v45  ;;  %v493_v22 = vld [vmem:[%s1444_s8 + $0x590] sm:$0xff] }
 0x155   : > { %v524_v48 = vld [vmem:[%s1444_s8 + $0x688] sm:$0xff]  ;;  %v523_v50 = vld [vmem:[%s1444_s8 + $0x680] sm:$0xff]  ;;  %725 = vmatpush2.msra.mxu1 %v527_v46  ;;  %649 = vmatprep.subr.mxu0 %v396_v47  ;;  %v362_v23 = vld [vmem:[%s1444_s8 + $0x178] sm:$0xff] }
 0x156   : > { %v392_v51 = vld [vmem:[%s1444_s8 + $0x268] sm:$0xff]  ;;  %726 = vmatprep.subr.mxu1 %v524_v48  ;;  %v391_v53 = vld [vmem:[%s1444_s8 + $0x260] sm:$0xff]  ;;  %650 = vmatpush2.msra.mxu0 %v395_v49  ;;  %v490_v24 = vld [vmem:[%s1444_s8 + $0x578] sm:$0xff] }
 0x157   : > { %v520_v52 = vld [vmem:[%s1444_s8 + $0x668] sm:$0xff]  ;;  %v519_v54 = vld [vmem:[%s1444_s8 + $0x660] sm:$0xff]  ;;  %727 = vmatpush2.msra.mxu1 %v523_v50  ;;  %651 = vmatprep.subr.mxu0 %v392_v51  ;;  %v361_v25 = vld [vmem:[%s1444_s8 + $0x170] sm:$0xff] }
 0x158   : > { %v388_v55 = vld [vmem:[%s1444_s8 + $0x248] sm:$0xff]  ;;  %728 = vmatprep.subr.mxu1 %v520_v52  ;;  %v387_v57 = vld [vmem:[%s1444_s8 + $0x240] sm:$0xff]  ;;  %652 = vmatpush2.msra.mxu0 %v391_v53  ;;  %v489_v26 = vld [vmem:[%s1444_s8 + $0x570] sm:$0xff] }
 0x159   : > { %v516_v56 = vld [vmem:[%s1444_s8 + $0x648] sm:$0xff]  ;;  %v515_v58 = vld [vmem:[%s1444_s8 + $0x640] sm:$0xff]  ;;  %729 = vmatpush2.msra.mxu1 %v519_v54  ;;  %653 = vmatprep.subr.mxu0 %v388_v55  ;;  %v358_v27 = vld [vmem:[%s1444_s8 + $0x158] sm:$0xff] }
 0x15a   : > { %v384_v59 = vld [vmem:[%s1444_s8 + $0x228] sm:$0xff]  ;;  %730 = vmatprep.subr.mxu1 %v516_v56  ;;  %v383_v61 = vld [vmem:[%s1444_s8 + $0x220] sm:$0xff]  ;;  %654 = vmatpush2.msra.mxu0 %v387_v57  ;;  %v486_v28 = vld [vmem:[%s1444_s8 + $0x558] sm:$0xff] }
 0x15b   : > { %v512_v60 = vld [vmem:[%s1444_s8 + $0x628] sm:$0xff]  ;;  %v511_v62 = vld [vmem:[%s1444_s8 + $0x620] sm:$0xff]  ;;  %731 = vmatpush2.msra.mxu1 %v515_v58  ;;  %655 = vmatprep.subr.mxu0 %v384_v59  ;;  %v357_v29 = vld [vmem:[%s1444_s8 + $0x150] sm:$0xff] }
 0x15c   : > { %v380_v63 = vld [vmem:[%s1444_s8 + $0x208] sm:$0xff]  ;;  %732 = vmatprep.subr.mxu1 %v512_v60  ;;  %v379_v1 = vld [vmem:[%s1444_s8 + $0x200] sm:$0xff]  ;;  %656 = vmatpush2.msra.mxu0 %v383_v61  ;;  %v485_v30 = vld [vmem:[%s1444_s8 + $0x550] sm:$0xff] }
 0x15d   : > { %v508_v0 = vld [vmem:[%s1444_s8 + $0x608] sm:$0xff]  ;;  %v507_v2 = vld [vmem:[%s1444_s8 + $0x600] sm:$0xff]  ;;  %733 = vmatpush2.msra.mxu1 %v511_v62  ;;  %657 = vmatprep.subr.mxu0 %v380_v63  ;;  %v354_v31 = vld [vmem:[%s1444_s8 + $0x138] sm:$0xff] }
 0x15e   : > { %734 = vmatprep.subr.mxu1 %v508_v0  ;;  %658 = vmatpush2.msra.mxu0 %v379_v1  ;;  %v482_v32 = vld [vmem:[%s1444_s8 + $0x538] sm:$0xff]  ;;  %v353_v33 = vld [vmem:[%s1444_s8 + $0x130] sm:$0xff] }
 0x15f   : > { %735 = vmatpush2.msra.mxu1 %v507_v2  ;;  %660 = vmatmul.mubr.f32.vlgmr.msra.gmra.mxu0 %v1304_v35  ;;  %v481_v34 = vld [vmem:[%s1444_s8 + $0x530] sm:$0xff]  ;;  %v350_v43 = vld [vmem:[%s1444_s8 + $0x118] sm:$0xff] }
 0x160   : > { %749 = vmatprep.subr.mxu0 %v378_v3  ;;  %826 = vmatprep.subr.mxu1 %v506_v4  ;;  %v478_v44 = vld [vmem:[%s1444_s8 + $0x518] sm:$0xff]  ;;  %v349_v45 = vld [vmem:[%s1444_s8 + $0x110] sm:$0xff] }
 0x161   : > { %737 = vmatmul.mubr.f32.vlgmr.msra.gmra.mxu1 %v1296_v36  ;;  %750 = vmatpush1.msra.mxu0 %v377_v5  ;;  %v477_v46 = vld [vmem:[%s1444_s8 + $0x510] sm:$0xff]  ;;  %v346_v47 = vld [vmem:[%s1444_s8 + $0xf8] sm:$0xff] }
 0x162   : > { %827 = vmatpush1.msra.mxu1 %v505_v6  ;;  %751 = vmatprep.subr.mxu0 %v374_v7  ;;  %v474_v48 = vld [vmem:[%s1444_s8 + $0x4f8] sm:$0xff]  ;;  %v345_v49 = vld [vmem:[%s1444_s8 + $0xf0] sm:$0xff] }
 0x163   : > { %828 = vmatprep.subr.mxu1 %v502_v8  ;;  %752 = vmatpush1.msra.mxu0 %v373_v9  ;;  %v473_v50 = vld [vmem:[%s1444_s8 + $0x4f0] sm:$0xff]  ;;  %v342_v51 = vld [vmem:[%s1444_s8 + $0xd8] sm:$0xff] }
 0x164   : > { %829 = vmatpush1.msra.mxu1 %v501_v12  ;;  %753 = vmatprep.subr.mxu0 %v370_v15  ;;  %v470_v52 = vld [vmem:[%s1444_s8 + $0x4d8] sm:$0xff]  ;;  %v341_v53 = vld [vmem:[%s1444_s8 + $0xd0] sm:$0xff] }
 0x165   : > { %830 = vmatprep.subr.mxu1 %v498_v16  ;;  %754 = vmatpush1.msra.mxu0 %v369_v17  ;;  %v469_v54 = vld [vmem:[%s1444_s8 + $0x4d0] sm:$0xff]  ;;  %v338_v55 = vld [vmem:[%s1444_s8 + $0xb8] sm:$0xff] }
 0x166   : > { %831 = vmatpush1.msra.mxu1 %v497_v18  ;;  %755 = vmatprep.subr.mxu0 %v366_v19  ;;  %v466_v56 = vld [vmem:[%s1444_s8 + $0x4b8] sm:$0xff]  ;;  %v337_v57 = vld [vmem:[%s1444_s8 + $0xb0] sm:$0xff] }
 0x167   : > { %832 = vmatprep.subr.mxu1 %v494_v20  ;;  %756 = vmatpush1.msra.mxu0 %v365_v21  ;;  %v465_v58 = vld [vmem:[%s1444_s8 + $0x4b0] sm:$0xff]  ;;  %v334_v59 = vld [vmem:[%s1444_s8 + $0x98] sm:$0xff] }
 0x168   : > { %833 = vmatpush1.msra.mxu1 %v493_v22  ;;  %757 = vmatprep.subr.mxu0 %v362_v23  ;;  %v462_v60 = vld [vmem:[%s1444_s8 + $0x498] sm:$0xff]  ;;  %v333_v61 = vld [vmem:[%s1444_s8 + $0x90] sm:$0xff] }
 0x169   : > { %834 = vmatprep.subr.mxu1 %v490_v24  ;;  %758 = vmatpush1.msra.mxu0 %v361_v25  ;;  %v461_v62 = vld [vmem:[%s1444_s8 + $0x490] sm:$0xff]  ;;  %v330_v63 = vld [vmem:[%s1444_s8 + $0x78] sm:$0xff] }
 0x16a   : > { %835 = vmatpush1.msra.mxu1 %v489_v26  ;;  %759 = vmatprep.subr.mxu0 %v358_v27  ;;  %v458_v0 = vld [vmem:[%s1444_s8 + $0x478] sm:$0xff]  ;;  %v329_v1 = vld [vmem:[%s1444_s8 + $0x70] sm:$0xff] }
 0x16b   : > { %836 = vmatprep.subr.mxu1 %v486_v28  ;;  %760 = vmatpush1.msra.mxu0 %v357_v29  ;;  %v457_v2 = vld [vmem:[%s1444_s8 + $0x470] sm:$0xff]  ;;  %v326_v3 = vld [vmem:[%s1444_s8 + $0x58] sm:$0xff] }
 0x16c   : > { %837 = vmatpush1.msra.mxu1 %v485_v30  ;;  %761 = vmatprep.subr.mxu0 %v354_v31  ;;  %v454_v4 = vld [vmem:[%s1444_s8 + $0x458] sm:$0xff]  ;;  %v325_v5 = vld [vmem:[%s1444_s8 + $0x50] sm:$0xff] }
 0x16d   : > { %838 = vmatprep.subr.mxu1 %v482_v32  ;;  %762 = vmatpush1.msra.mxu0 %v353_v33  ;;  %v453_v6 = vld [vmem:[%s1444_s8 + $0x450] sm:$0xff]  ;;  %v322_v7 = vld [vmem:[%s1444_s8 + $0x38] sm:$0xff] }
 0x16e   : > { %839 = vmatpush1.msra.mxu1 %v481_v34  ;;  %763 = vmatprep.subr.mxu0 %v350_v43  ;;  %v450_v8 = vld [vmem:[%s1444_s8 + $0x438] sm:$0xff]  ;;  %v321_v9 = vld [vmem:[%s1444_s8 + $0x30] sm:$0xff] }
 0x16f   : > { %840 = vmatprep.subr.mxu1 %v478_v44  ;;  %764 = vmatpush1.msra.mxu0 %v349_v45  ;;  %v449_v12 = vld [vmem:[%s1444_s8 + $0x430] sm:$0xff]  ;;  %v318_v15 = vld [vmem:[%s1444_s8 + $0x18] sm:$0xff] }
 0x170   : > { %841 = vmatpush1.msra.mxu1 %v477_v46  ;;  %765 = vmatprep.subr.mxu0 %v346_v47  ;;  %v446_v16 = vld [vmem:[%s1444_s8 + $0x418] sm:$0xff]  ;;  %v317_v17 = vld [vmem:[%s1444_s8 + $0x10] sm:$0xff] }
 0x171   : > { %842 = vmatprep.subr.mxu1 %v474_v48  ;;  %766 = vmatpush1.msra.mxu0 %v345_v49  ;;  %v445_v18 = vld [vmem:[%s1444_s8 + $0x410] sm:$0xff]  ;;  %v442_v19 = vld [vmem:[%s1444_s8 + $0x3f8] sm:$0xff] }
 0x172   : > { %843 = vmatpush1.msra.mxu1 %v473_v50  ;;  %767 = vmatprep.subr.mxu0 %v342_v51  ;;  %v570_v20 = vld [vmem:[%s1444_s8 + $0x7f8] sm:$0xff]  ;;  %v441_v21 = vld [vmem:[%s1444_s8 + $0x3f0] sm:$0xff] }
 0x173   : > { %844 = vmatprep.subr.mxu1 %v470_v52  ;;  %768 = vmatpush1.msra.mxu0 %v341_v53  ;;  %v569_v22 = vld [vmem:[%s1444_s8 + $0x7f0] sm:$0xff]  ;;  %v438_v23 = vld [vmem:[%s1444_s8 + $0x3d8] sm:$0xff] }
 0x174   : > { %845 = vmatpush1.msra.mxu1 %v469_v54  ;;  %769 = vmatprep.subr.mxu0 %v338_v55  ;;  %v566_v24 = vld [vmem:[%s1444_s8 + $0x7d8] sm:$0xff]  ;;  %v437_v25 = vld [vmem:[%s1444_s8 + $0x3d0] sm:$0xff] }
 0x175   : > { %846 = vmatprep.subr.mxu1 %v466_v56  ;;  %770 = vmatpush1.msra.mxu0 %v337_v57  ;;  %v565_v26 = vld [vmem:[%s1444_s8 + $0x7d0] sm:$0xff]  ;;  %v434_v27 = vld [vmem:[%s1444_s8 + $0x3b8] sm:$0xff] }
 0x176   : > { %847 = vmatpush1.msra.mxu1 %v465_v58  ;;  %771 = vmatprep.subr.mxu0 %v334_v59  ;;  %v562_v28 = vld [vmem:[%s1444_s8 + $0x7b8] sm:$0xff]  ;;  %v433_v29 = vld [vmem:[%s1444_s8 + $0x3b0] sm:$0xff] }
 0x177   : > { %848 = vmatprep.subr.mxu1 %v462_v60  ;;  %772 = vmatpush1.msra.mxu0 %v333_v61  ;;  %v561_v30 = vld [vmem:[%s1444_s8 + $0x7b0] sm:$0xff]  ;;  %v430_v31 = vld [vmem:[%s1444_s8 + $0x398] sm:$0xff] }
 0x178   : > { %849 = vmatpush1.msra.mxu1 %v461_v62  ;;  %773 = vmatprep.subr.mxu0 %v330_v63  ;;  %v558_v32 = vld [vmem:[%s1444_s8 + $0x798] sm:$0xff]  ;;  %v429_v33 = vld [vmem:[%s1444_s8 + $0x390] sm:$0xff] }
 0x179   : > { %850 = vmatprep.subr.mxu1 %v458_v0  ;;  %774 = vmatpush1.msra.mxu0 %v329_v1  ;;  %v557_v34 = vld [vmem:[%s1444_s8 + $0x790] sm:$0xff]  ;;  %v426_v43 = vld [vmem:[%s1444_s8 + $0x378] sm:$0xff] }
 0x17a   : > { %851 = vmatpush1.msra.mxu1 %v457_v2  ;;  %775 = vmatprep.subr.mxu0 %v326_v3  ;;  %v554_v44 = vld [vmem:[%s1444_s8 + $0x778] sm:$0xff]  ;;  %v425_v45 = vld [vmem:[%s1444_s8 + $0x370] sm:$0xff] }
 0x17b   : > { %852 = vmatprep.subr.mxu1 %v454_v4  ;;  %776 = vmatpush1.msra.mxu0 %v325_v5  ;;  %v553_v46 = vld [vmem:[%s1444_s8 + $0x770] sm:$0xff]  ;;  %v422_v47 = vld [vmem:[%s1444_s8 + $0x358] sm:$0xff] }
 0x17c   : > { %853 = vmatpush1.msra.mxu1 %v453_v6  ;;  %777 = vmatprep.subr.mxu0 %v322_v7  ;;  %v550_v48 = vld [vmem:[%s1444_s8 + $0x758] sm:$0xff]  ;;  %v421_v49 = vld [vmem:[%s1444_s8 + $0x350] sm:$0xff] }
 0x17d   : > { %854 = vmatprep.subr.mxu1 %v450_v8  ;;  %778 = vmatpush1.msra.mxu0 %v321_v9  ;;  %v549_v50 = vld [vmem:[%s1444_s8 + $0x750] sm:$0xff]  ;;  %v418_v51 = vld [vmem:[%s1444_s8 + $0x338] sm:$0xff] }
 0x17e   : > { %855 = vmatpush1.msra.mxu1 %v449_v12  ;;  %779 = vmatprep.subr.mxu0 %v318_v15  ;;  %v546_v52 = vld [vmem:[%s1444_s8 + $0x738] sm:$0xff]  ;;  %v417_v53 = vld [vmem:[%s1444_s8 + $0x330] sm:$0xff] }
 0x17f   : > { %856 = vmatprep.subr.mxu1 %v446_v16  ;;  %780 = vmatpush1.msra.mxu0 %v317_v17  ;;  %v545_v54 = vld [vmem:[%s1444_s8 + $0x730] sm:$0xff]  ;;  %v414_v55 = vld [vmem:[%s1444_s8 + $0x318] sm:$0xff] }
 0x180   : > { %857 = vmatpush1.msra.mxu1 %v445_v18  ;;  %781 = vmatprep.subr.mxu0 %v442_v19  ;;  %v542_v56 = vld [vmem:[%s1444_s8 + $0x718] sm:$0xff]  ;;  %v413_v57 = vld [vmem:[%s1444_s8 + $0x310] sm:$0xff] }
 0x181   : > { %858 = vmatprep.subr.mxu1 %v570_v20  ;;  %782 = vmatpush2.msra.mxu0 %v441_v21  ;;  %v541_v58 = vld [vmem:[%s1444_s8 + $0x710] sm:$0xff]  ;;  %v410_v59 = vld [vmem:[%s1444_s8 + $0x2f8] sm:$0xff] }
 0x182   : > { %859 = vmatpush2.msra.mxu1 %v569_v22  ;;  %783 = vmatprep.subr.mxu0 %v438_v23  ;;  %v538_v60 = vld [vmem:[%s1444_s8 + $0x6f8] sm:$0xff]  ;;  %v409_v61 = vld [vmem:[%s1444_s8 + $0x2f0] sm:$0xff] }
 0x183   : > { %860 = vmatprep.subr.mxu1 %v566_v24  ;;  %784 = vmatpush2.msra.mxu0 %v437_v25  ;;  %v537_v62 = vld [vmem:[%s1444_s8 + $0x6f0] sm:$0xff]  ;;  %v406_v63 = vld [vmem:[%s1444_s8 + $0x2d8] sm:$0xff] }
 0x184   : > { %861 = vmatpush2.msra.mxu1 %v565_v26  ;;  %785 = vmatprep.subr.mxu0 %v434_v27  ;;  %v534_v0 = vld [vmem:[%s1444_s8 + $0x6d8] sm:$0xff]  ;;  %v405_v1 = vld [vmem:[%s1444_s8 + $0x2d0] sm:$0xff] }
 0x185   : > { %862 = vmatprep.subr.mxu1 %v562_v28  ;;  %786 = vmatpush2.msra.mxu0 %v433_v29  ;;  %v533_v2 = vld [vmem:[%s1444_s8 + $0x6d0] sm:$0xff]  ;;  %v402_v3 = vld [vmem:[%s1444_s8 + $0x2b8] sm:$0xff] }
 0x186   : > { %863 = vmatpush2.msra.mxu1 %v561_v30  ;;  %787 = vmatprep.subr.mxu0 %v430_v31  ;;  %v530_v4 = vld [vmem:[%s1444_s8 + $0x6b8] sm:$0xff]  ;;  %v401_v5 = vld [vmem:[%s1444_s8 + $0x2b0] sm:$0xff]  ;;  %v573_v31 = vld [vmem:[%s572_s6] sm:$0xf] }
 0x187   : > { %864 = vmatprep.subr.mxu1 %v558_v32  ;;  %788 = vmatpush2.msra.mxu0 %v429_v33  ;;  %v529_v6 = vld [vmem:[%s1444_s8 + $0x6b0] sm:$0xff]  ;;  %v398_v7 = vld [vmem:[%s1444_s8 + $0x298] sm:$0xff]  ;;  %v582_v32 = vrot.slane %v573_v31, %v1388_v13 }
 0x188   : > { %865 = vmatpush2.msra.mxu1 %v557_v34  ;;  %789 = vmatprep.subr.mxu0 %v426_v43  ;;  %v526_v8 = vld [vmem:[%s1444_s8 + $0x698] sm:$0xff]  ;;  %v397_v9 = vld [vmem:[%s1444_s8 + $0x290] sm:$0xff] }
 0x189   : > { %866 = vmatprep.subr.mxu1 %v554_v44  ;;  %790 = vmatpush2.msra.mxu0 %v425_v45  ;;  %v525_v12 = vld [vmem:[%s1444_s8 + $0x690] sm:$0xff]  ;;  %v394_v15 = vld [vmem:[%s1444_s8 + $0x278] sm:$0xff] }
 0x18a   : > { %867 = vmatpush2.msra.mxu1 %v553_v46  ;;  %791 = vmatprep.subr.mxu0 %v422_v47  ;;  %v522_v16 = vld [vmem:[%s1444_s8 + $0x678] sm:$0xff]  ;;  %v393_v17 = vld [vmem:[%s1444_s8 + $0x270] sm:$0xff] }
 0x18b   : > { %868 = vmatprep.subr.mxu1 %v550_v48  ;;  %792 = vmatpush2.msra.mxu0 %v421_v49  ;;  %v521_v18 = vld [vmem:[%s1444_s8 + $0x670] sm:$0xff]  ;;  %v390_v19 = vld [vmem:[%s1444_s8 + $0x258] sm:$0xff] }
 0x18c   : > { %869 = vmatpush2.msra.mxu1 %v549_v50  ;;  %793 = vmatprep.subr.mxu0 %v418_v51  ;;  %v518_v20 = vld [vmem:[%s1444_s8 + $0x658] sm:$0xff]  ;;  %v389_v21 = vld [vmem:[%s1444_s8 + $0x250] sm:$0xff]  ;;  %v586_v51 = vrot.slane %v573_v31, %v1386_v11 }
 0x18d   : > { %870 = vmatprep.subr.mxu1 %v546_v52  ;;  %794 = vmatpush2.msra.mxu0 %v417_v53  ;;  %v517_v22 = vld [vmem:[%s1444_s8 + $0x650] sm:$0xff]  ;;  %v386_v23 = vld [vmem:[%s1444_s8 + $0x238] sm:$0xff]  ;;  %v590_v53 = vrot.slane %v573_v31, %v1390_v14 }
 0x18e   : > { %871 = vmatpush2.msra.mxu1 %v545_v54  ;;  %795 = vmatprep.subr.mxu0 %v414_v55  ;;  %v514_v24 = vld [vmem:[%s1444_s8 + $0x638] sm:$0xff]  ;;  %v385_v25 = vld [vmem:[%s1444_s8 + $0x230] sm:$0xff] }
 0x18f   : > { %872 = vmatprep.subr.mxu1 %v542_v56  ;;  %796 = vmatpush2.msra.mxu0 %v413_v57  ;;  %v513_v26 = vld [vmem:[%s1444_s8 + $0x630] sm:$0xff]  ;;  %v382_v27 = vld [vmem:[%s1444_s8 + $0x218] sm:$0xff] }
 0x190   : > { %873 = vmatpush2.msra.mxu1 %v541_v58  ;;  %797 = vmatprep.subr.mxu0 %v410_v59  ;;  %v510_v28 = vld [vmem:[%s1444_s8 + $0x618] sm:$0xff]  ;;  %v381_v29 = vld [vmem:[%s1444_s8 + $0x210] sm:$0xff] }
 0x191   : > { %874 = vmatprep.subr.mxu1 %v538_v60  ;;  %798 = vmatpush2.msra.mxu0 %v409_v61  ;;  %v509_v30 = vld [vmem:[%s1444_s8 + $0x610] sm:$0xff] }
 0x192   : > { %875 = vmatpush2.msra.mxu1 %v537_v62  ;;  %799 = vmatprep.subr.mxu0 %v406_v63 }
 0x193   : > { %876 = vmatprep.subr.mxu1 %v534_v0  ;;  %800 = vmatpush2.msra.mxu0 %v405_v1 }
 0x194   : > { %877 = vmatpush2.msra.mxu1 %v533_v2  ;;  %801 = vmatprep.subr.mxu0 %v402_v3 }
 0x195   : > { %878 = vmatprep.subr.mxu1 %v530_v4  ;;  %802 = vmatpush2.msra.mxu0 %v401_v5 }
 0x196   : > { %879 = vmatpush2.msra.mxu1 %v529_v6  ;;  %803 = vmatprep.subr.mxu0 %v398_v7 }
 0x197   : > { %880 = vmatprep.subr.mxu1 %v526_v8  ;;  %804 = vmatpush2.msra.mxu0 %v397_v9 }
 0x198   : > { %881 = vmatpush2.msra.mxu1 %v525_v12  ;;  %805 = vmatprep.subr.mxu0 %v394_v15 }
 0x199   : > { %882 = vmatprep.subr.mxu1 %v522_v16  ;;  %665 = vmatprep.mubr.f32.mxu0 %v1284_v41  ;;  %v911_v16 = vld [vmem:[#allocation10] sm:$0xf] (%p300_p11) }
 0x19a   : > { %806 = vmatpush2.msra.mxu0 %v393_v17  ;;  %883 = vmatpush2.msra.mxu1 %v521_v18  ;;  %v916_v17 = vrot.slane (%p300_p11), %v911_v16, %v1384_v10  ;;  %v920_v18 = vrot.slane (%p300_p11), %v911_v16, %v1388_v13  ;;  %v1014_v13 = vld [vmem:[#allocation2] ss:$0 sm:$0xff] (%p300_p11) }
 0x19b   : > { %666 = vmatmul.mubr.f32.gmra.mxu0 %v1288_v39  ;;  %807 = vmatprep.subr.mxu0 %v390_v19  ;;  %v924_v19 = vrot.slane (%p300_p11), %v911_v16, %v1386_v11 }
 0x19c   : > { %884 = vmatprep.subr.mxu1 %v518_v20  ;;  %742 = vmatprep.mubr.f32.mxu1 %v1276_v42  ;;  %v928_v20 = vrot.slane (%p300_p11), %v911_v16, %v1390_v14 }
 0x19d   : > { %808 = vmatpush2.msra.mxu0 %v389_v21  ;;  %885 = vmatpush2.msra.mxu1 %v517_v22 }
 0x19e   : > { %809 = vmatprep.subr.mxu0 %v386_v23  ;;  %743 = vmatmul.mubr.f32.gmra.mxu1 %v1280_v40 }
 0x19f   : > { %886 = vmatprep.subr.mxu1 %v514_v24  ;;  %810 = vmatpush2.msra.mxu0 %v385_v25 }
 0x1a0   : > { %887 = vmatpush2.msra.mxu1 %v513_v26  ;;  %811 = vmatprep.subr.mxu0 %v382_v27 }
 0x1a1   : > { %888 = vmatprep.subr.mxu1 %v510_v28  ;;  %812 = vmatpush2.msra.mxu0 %v381_v29 }
 0x1a2   : > { %813 = vmatprep.mubr.f32.mxu0 %v1300_v37  ;;  %889 = vmatpush2.msra.mxu1 %v509_v30  ;;  %v578_v37 = vrot.slane %v573_v31, %v1384_v10 }
 0x1a3   : > { %890 = vmatprep.mubr.f32.mxu1 %v1292_v38  ;;  %814 = vmatmul.mubr.f32.vlgmr.msra.gmra.mxu0 %v1304_v35 }
 0x1a4   : > { %891 = vmatmul.mubr.f32.vlgmr.msra.gmra.mxu1 %v1296_v36  ;;  %819 = vmatprep.mubr.f32.mxu0 %v1284_v41 }
 0x1a5   : > { %896 = vmatprep.mubr.f32.mxu1 %v1276_v42 }
 0x1a7   : > { %820 = vmatmul.mubr.f32.gmra.mxu0 %v1288_v39 }
 0x1a8   : > { %897 = vmatmul.mubr.f32.gmra.mxu1 %v1280_v40 }
 0x21f   : > { %v661_v38 = vpop.f32.mrf.mxu0 }
 0x220   : > { %v662_v33 = vadd.f32 %v661_v38, %v578_v37 }
 0x221   : > { %v738_v35 = vpop.f32.mrf.mxu1  ;;  %v663_v34 = vpop.f32.mrf.mxu0 }
 0x222   : > { %v739_v36 = vadd.f32 %v738_v35, %v662_v33  ;;  %v664_v43 = vadd.f32 %v663_v34, %v582_v32 }
 0x223   : > { %v740_v41 = vpop.f32.mrf.mxu1 }
 0x224   : > { %1116 = vtanh.f32 %v739_v36  ;;  %v741_v42 = vadd.f32 %v740_v41, %v664_v43 }
 0x226   : > { %1118 = vtanh.f32 %v741_v42 }
 0x231   : > { %v1117_v44 = vpop.eup %1116  }
 0x232   : > { %v1765_v35 = vmov %v1117_v44  ;;  %v933_v21 = vmul.f32 (%p300_p11), %v1117_v44, %v916_v17 }
 0x233   : > { %v1119_v45 = vpop.eup %1118  }
 0x234   :  { %v934_v22 = vmul.f32 (%p300_p11), %v1119_v45, %v920_v18 }
 0x236   :  { %v941_v28 = vadd.f32 (%p300_p11), %v934_v22, %v933_v21 }
 0x25b   : > { %v667_v39 = vpop.f32.mrf.mxu0 }
 0x25c   : > { %v668_v40 = vadd.f32 %v667_v39, %v578_v37  ;;  %v1764_v37 = vmov %v1119_v45 }
 0x25d   : > { %v669_v46 = vpop.f32.mrf.mxu0 }
 0x25e   : > { %v670_v47 = vadd.f32 %v669_v46, %v582_v32  ;;  %v744_v48 = vpop.f32.mrf.mxu1 }
 0x25f   : > { %v745_v49 = vadd.f32 %v744_v48, %v668_v40 }
 0x260   : > { %v746_v50 = vpop.f32.mrf.mxu1 }
 0x261   : > { %1120 = vtanh.f32 %v745_v49  ;;  %v747_v52 = vadd.f32 %v746_v50, %v670_v47 }
 0x263   : > { %1122 = vtanh.f32 %v747_v52  ;;  %v815_v54 = vpop.f32.mrf.mxu0 }
 0x264   : > { %v892_v55 = vpop.f32.mrf.mxu1  ;;  %v816_v56 = vadd.f32 %v815_v54, %v586_v51 }
 0x265   : > { %v817_v57 = vpop.f32.mrf.mxu0 }
 0x266   : > { %v894_v58 = vpop.f32.mrf.mxu1  ;;  %v893_v59 = vadd.f32 %v892_v55, %v816_v56  ;;  %v818_v60 = vadd.f32 %v817_v57, %v590_v53 }
 0x267   : > { %v821_v61 = vpop.f32.mrf.mxu0 }
 0x268   : > { %v898_v62 = vpop.f32.mrf.mxu1  ;;  %1124 = vtanh.f32 %v893_v59  ;;  %v895_v63 = vadd.f32 %v894_v58, %v818_v60  ;;  %v822_v0 = vadd.f32 %v821_v61, %v586_v51 }
 0x269   : > { %v823_v1 = vpop.f32.mrf.mxu0 }
 0x26a   : > { %1126 = vtanh.f32 %v895_v63  ;;  %v899_v2 = vadd.f32 %v898_v62, %v822_v0  ;;  %v824_v3 = vadd.f32 %v823_v1, %v590_v53  ;;  %v900_v4 = vpop.f32.mrf.mxu1 }
 0x26c   : > { %1128 = vtanh.f32 %v899_v2  ;;  %v901_v5 = vadd.f32 %v900_v4, %v824_v3 }
 0x26e   : > { %v1121_v6 = vpop.eup %1120   ;;  %1130 = vtanh.f32 %v901_v5 }
 0x26f   : > { %v1761_v39 = vmov %v1121_v6  ;;  %v937_v24 = vmul.f32 (%p300_p11), %v1121_v6, %v916_v17 }
 0x270   : > { %v1123_v7 = vpop.eup %1122  }
 0x271   : > { %v1760_v41 = vmov %v1123_v7  ;;  %v938_v25 = vmul.f32 (%p300_p11), %v1123_v7, %v920_v18 }
 0x273   :  { %v946_v29 = vadd.f32 (%p300_p11), %v938_v25, %v937_v24 }
 0x275   : > { %v1125_v8 = vpop.eup %1124  }
 0x276   : > { %v1763_v36 = vmov %v1125_v8  ;;  %v935_v23 = vmul.f32 (%p300_p11), %v1125_v8, %v924_v19 }
 0x277   : > { %v1127_v9 = vpop.eup %1126  }
 0x278   : > { %v1762_v38 = vmov %v1127_v9  ;;  %302 = sbr.rel (!%p300_p11) target bundleno = 284 (0x11c), region = 77  ;;  %v936_v27 = vmul.f32 (%p300_p11), %v1127_v9, %v928_v20  ;;  %v942_v30 = vadd.f32 (%p300_p11), %v941_v28, %v935_v23 }
 0x279   : > { %v1129_v12 = vpop.eup %1128  }
 0x27a   : > { %v1759_v40 = vmov %v1129_v12  ;;  %v939_v26 = vmul.f32 (%p300_p11), %v1129_v12, %v924_v19  ;;  %v943_v32 = vadd.f32 (%p300_p11), %v942_v30, %v936_v27 }
 0x27b   : > { %v1131_v15 = vpop.eup %1130  }
 0x27c   : > { %v1758_v42 = vmov %v1131_v15  ;;  %v940_v31 = vmul.f32 (%p300_p11), %v1131_v15, %v928_v20  ;;  %v947_v37 = vadd.f32 (%p300_p11), %v946_v29, %v939_v26  ;;  %944 = vadd.xlane.f32.xlu0 (%p300_p11), %v943_v32 }
 0x27e   :  { %v948_v10 = vadd.f32 %v947_v37, %v940_v31 }
 0x280   :  { %949 = vadd.xlane.f32.xlu0 %v948_v10 }
 0x305   :  { %v945_v11 = vpop.xlane.xlu0 %944 }
 0x306   :  { %v958_v14 = vadd.f32 %v1014_v13, %v945_v11 }
 0x308   :  { %961 = vst.msk [vmem:[%s1757_s7] sm:$0xff] %vm960_vm2, %v958_v14 }
 0x309   :  { %v950_v38 = vpop.xlane.xlu0 %949 }
 0x30a   :  { %v959_v33 = vadd.f32 %v1014_v13, %v950_v38 }
 0x30c   :  { %962 = vst.msk [vmem:[%s1757_s7 + $0x8] sm:$0xff] %vm960_vm2, %v959_v33 }
 0x30d   :  { %967 = vsyncpa [#allocation4], 1 }
 0x30e   :  { %968 = vsyncpa [#allocation6], 1 }
 0x30f   :  { %969 = vsyncpa [#allocation9], 1 }

</bundles_post_ra>
